<compile_context>
chip_gen: v5e
topology: v5e:2x2
jax: 0.10.0
libtpu: 0.0.40
codegen_flags: <defaults>
</compile_context>

<pallas_src>
import functools

import jax
import jax.numpy as jnp
from jax import lax
from jax.experimental import pallas as pl
from jax.experimental.pallas import tpu as pltpu


def _make_mask_kernel(x_ref, m_ref, bias_ref, o_ref, *, wrow):
    """x_ref:    (TB, C, HWp) VMEM  zero-padded planes, flattened, lane-dense
       m_ref:    (9, C)       VMEM  fused (conv2-tap x conv1) weights, tap-major (di*3+dj)
       bias_ref: (1, HWp)     VMEM  precomputed conv2(conv1-bias on interior), f32
       o_ref:    (TB, 1, HWp) VMEM  sigmoid output (flat, lane-dense)
    """
    tb = x_ref.shape[0]
    hwp = x_ref.shape[2]
    m = m_ref[...]                                   # (9, C), stays resident in VMEM
    bias = bias_ref[...]                             # (1, HWp), f32

    for b in range(tb):                              # TB is small and static
        xr = jnp.maximum(x_ref[b], 0.0)              # ReLU, input dtype (bf16 stays bf16)
        # conv1 (1x1) + conv2 channel-mix in one MXU matmul, f32 accumulation.
        g = jnp.dot(m, xr, preferred_element_type=jnp.float32)      # (9, HWp)

        # conv2 spatial gather: 9 taps = shifted copies of g's rows.  Shifts are flat
        # rolls (XLU); wrapped values only reach rows/cols that are sliced off later.
        acc = bias + g[0:1, :]                       # tap (di=0, dj=0): no shift
        for di in range(3):
            for dj in range(3):
                if di == 0 and dj == 0:
                    continue
                t = di * 3 + dj
                shift = di * wrow + dj               # flat offset of this tap
                acc = acc + pltpu.roll(g[t:t + 1, :], hwp - shift, axis=1)

        # sigmoid(x) == 0.5*tanh(0.5*x) + 0.5  (tanh -> EUP, no VALU divide)
        o_ref[b] = (0.5 * jnp.tanh(0.5 * acc) + 0.5).astype(o_ref.dtype)


def _pick_batch_tile(n, per_elem_bytes, tb_cap, vmem_budget_bytes):
    """Largest divisor of n that fits the VMEM budget, prefers >= 2 grid steps (v7x)."""
    cap = max(1, min(tb_cap, int(vmem_budget_bytes // max(per_elem_bytes, 1))))
    divs = [d for d in range(1, min(cap, n) + 1) if n % d == 0]
    two_step = [d for d in divs if n // d >= 2]      # keep both v7x TensorCores busy
    return max(two_step) if two_step else max(divs)


def make_mask_pallas(x, w1, b1, w2, *, tb_cap=8, vmem_budget_bytes=24 * 1024 * 1024):
    """x: (N, C, H, W); w1: (4, C); b1: (4,); w2: (1, 4, 3, 3).  Returns (N, 1, H, W)."""
    N, C, H, W = x.shape
    Hp, Wrow = H + 2, W + 2                          # padded plane (conv2 halo)
    flat = Hp * Wrow
    HWp = ((flat + 127) // 128) * 128                # lane-dense flat row (mult. of 128)

    w1f = jnp.asarray(w1, jnp.float32)               # (4, C)
    w2f = jnp.asarray(w2, jnp.float32)               # (1, 4, 3, 3)
    b1f = jnp.asarray(b1, jnp.float32)               # (4,)

    # Fused weights: M[t, c] = sum_o w2[o, t] * w1[o, c]   (t = di*3 + dj)
    w2_taps = w2f[0].reshape(4, 9)                   # (in_ch, tap)
    m = (w2_taps.T @ w1f).astype(x.dtype)            # (9, C); bf16 inputs -> bf16 MXU

    # conv1-bias contribution, hoisted: conv2 applied to (b1 on real pixels, 0 on ring).
    wsum = jnp.einsum('o,oij->ij', b1f, w2f[0])      # (3, 3)
    ones_pad = jnp.pad(jnp.ones((H, W), jnp.float32), 1)
    bias_conv = jnp.zeros((H, W), jnp.float32)
    for di in range(3):
        for dj in range(3):
            bias_conv = bias_conv + wsum[di, dj] * ones_pad[di:di + H, dj:dj + W]
    bias_flat = jnp.pad(jnp.pad(bias_conv, ((0, Hp - H), (0, Wrow - W))).reshape(-1),
                        (0, HWp - flat)).reshape(1, HWp)

    # Lane-dense flat input: zero halo materialised, plane flattened, padded to 128-mult.
    x_pad = jnp.pad(x, ((0, 0), (0, 0), (1, 1), (1, 1)))               # (N, C, Hp, Wrow)
    x_flat = jnp.pad(x_pad.reshape(N, C, flat), ((0, 0), (0, 0), (0, HWp - flat)))

    # Batch tile: double-buffered in/out blocks + f32 temporaries (xr, g, acc) per image.
    in_b = x.dtype.itemsize
    per_elem = HWp * (2 * C * in_b + 2 * in_b + 4 * (C + 9 + 2))
    tb = _pick_batch_tile(N, per_elem, tb_cap, vmem_budget_bytes)

    cost = pl.CostEstimate(
        flops=2 * N * HWp * 9 * C + 9 * N * HWp,
        transcendentals=N * HWp,
        bytes_accessed=N * C * HWp * in_b + N * HWp * in_b,
    )

    out_flat = pl.pallas_call(
        functools.partial(_make_mask_kernel, wrow=Wrow),
        out_shape=jax.ShapeDtypeStruct((N, 1, HWp), x.dtype),
        grid_spec=pltpu.PrefetchScalarGridSpec(
            num_scalar_prefetch=0,
            grid=(N // tb,),
            in_specs=[
                pl.BlockSpec((tb, C, HWp), lambda n: (n, 0, 0)),   # streamed, double-buffered
                pl.BlockSpec((9, C), lambda n: (0, 0)),            # fused weights, resident
                pl.BlockSpec((1, HWp), lambda n: (0, 0)),          # bias plane, resident
            ],
            out_specs=pl.BlockSpec((tb, 1, HWp), lambda n: (n, 0, 0)),
        ),
        compiler_params=pltpu.CompilerParams(
            dimension_semantics=("parallel",),        # batch tiles shard across v7x's 2 TCs
            vmem_limit_bytes=32 * 1024 * 1024,        # within v7x's 64 MiB physical VMEM
        ),
        cost_estimate=cost,
    )(x_flat, m, bias_flat)

    # TODO(synk): for very large H*W where even TB=1 exceeds the VMEM budget, add
    # halo'd row-tiling (overlapping row windows) as a second "parallel" grid axis.
    out = out_flat[:, :, :flat].reshape(N, 1, Hp, Wrow)[:, :, :H, :W]
    return out


def _reference(x, w1, b1, w2):
    y = jnp.maximum(x, 0.0)
    y = jnp.einsum('nchw,oc->nohw', y, w1) + b1[None, :, None, None]
    y = lax.conv_general_dilated(y, w2, window_strides=(1, 1), padding='SAME',
                                 dimension_numbers=('NCHW', 'OIHW', 'NCHW'))
    return 1.0 / (1.0 + jnp.exp(-y))


if __name__ == "__main__":
    N, C, H, W = 2, 4, 16, 16
    key = jax.random.PRNGKey(0)
    kx, k1, k2, kb = jax.random.split(key, 4)

    x = jax.random.normal(kx, (N, C, H, W), dtype=jnp.float32)

    # Deterministic conv param init (kaiming-uniform-like bounds, as in nn.Conv2d)
    bound1 = 1.0 / (C ** 0.5)
    w1 = jax.random.uniform(k1, (4, C), minval=-bound1, maxval=bound1, dtype=jnp.float32)
    b1 = jnp.zeros((4,), jnp.float32)          # module: nn.init.constant_(conv1.bias, 0)
    bound2 = 1.0 / ((4 * 3 * 3) ** 0.5)
    w2 = jax.random.uniform(k2, (1, 4, 3, 3), minval=-bound2, maxval=bound2,
                            dtype=jnp.float32)

    out = make_mask_pallas(x, w1, b1, w2)
    jax.block_until_ready(out)
    ref = _reference(x, w1, b1, w2)
    assert out.shape == (N, 1, H, W), out.shape
    assert jnp.allclose(out, ref, atol=1e-5, rtol=1e-5), float(jnp.max(jnp.abs(out - ref)))

    # Exercise a non-zero conv1 bias to verify the hoisted bias plane keeps the conv2
    # zero-padding ring bias-free.
    b1_nz = jax.random.uniform(kb, (4,), minval=-bound1, maxval=bound1, dtype=jnp.float32)
    out2 = make_mask_pallas(x, w1, b1_nz, w2)
    jax.block_until_ready(out2)
    assert jnp.allclose(out2, _reference(x, w1, b1_nz, w2), atol=1e-5, rtol=1e-5)

    print("KERNEL_OK")
</pallas_src>

<mosaic_0001>
module attributes {stable_mosaic.version = 11 : i64} {
  func.func @_make_mask_kernel(%arg0: i32, %arg1: memref<1x4x384xf32, #tpu.memory_space<vmem>>, %arg2: memref<9x4xf32, #tpu.memory_space<vmem>>, %arg3: memref<1x384xf32, #tpu.memory_space<vmem>>, %arg4: memref<1x1x384xf32, #tpu.memory_space<vmem>>) attributes {dimension_semantics = [#tpu.dimension_semantics<parallel>], iteration_bounds = array<i64: 2>, scalar_prefetch = 0 : i64, scratch_operands = 0 : i64, tpu.core_type = #tpu.core_type<tc>, window_params = [{transform_indices = @transform_0, window_bounds = array<i64: 1, 4, 384>}, {pipeline_mode = #tpu.pipeline_mode<synchronous>, transform_indices = @transform_1, window_bounds = array<i64: 9, 4>}, {pipeline_mode = #tpu.pipeline_mode<synchronous>, transform_indices = @transform_2, window_bounds = array<i64: 1, 384>}, {transform_indices = @transform_3, window_bounds = array<i64: 1, 1, 384>}]} {
    %c0 = arith.constant 0 : index
    %c0_0 = arith.constant 0 : index
    %0 = vector.load %arg2[%c0, %c0_0] : memref<9x4xf32, #tpu.memory_space<vmem>>, vector<9x4xf32>
    %c0_1 = arith.constant 0 : index
    %c0_2 = arith.constant 0 : index
    %1 = vector.load %arg3[%c0_1, %c0_2] : memref<1x384xf32, #tpu.memory_space<vmem>>, vector<1x384xf32>
    %c0_3 = arith.constant 0 : index
    %c0_4 = arith.constant 0 : index
    %c0_5 = arith.constant 0 : index
    %2 = vector.load %arg1[%c0_3, %c0_4, %c0_5] : memref<1x4x384xf32, #tpu.memory_space<vmem>>, vector<1x4x384xf32>
    %3 = vector.shape_cast %2 : vector<1x4x384xf32> to vector<4x384xf32>
    %cst = arith.constant 0.000000e+00 : f32
    %4 = vector.broadcast %cst : f32 to vector<4x384xf32>
    %5 = arith.maximumf %3, %4 : vector<4x384xf32>
    %cst_6 = arith.constant dense<0.000000e+00> : vector<9x384xf32>
    %6 = tpu.matmul %0, %5, %cst_6 {dimension_numbers = #tpu.dot_dimension_numbers<[1], [0], [0], [1], [0, 0, 1, 1], [], []>} : vector<9x4xf32>, vector<4x384xf32>, vector<9x384xf32> -> vector<9x384xf32>
    %7 = vector.extract_strided_slice %6 {offsets = [0, 0], sizes = [1, 384], strides = [1, 1]} : vector<9x384xf32> to vector<1x384xf32>
    %8 = arith.addf %1, %7 : vector<1x384xf32>
    %9 = vector.extract_strided_slice %6 {offsets = [1, 0], sizes = [1, 384], strides = [1, 1]} : vector<9x384xf32> to vector<1x384xf32>
    %c383_i32 = arith.constant 383 : i32
    %10 = tpu.dynamic_rotate %9 by %c383_i32 dim 1 : vector<1x384xf32>, i32 -> vector<1x384xf32>
    %11 = arith.addf %8, %10 : vector<1x384xf32>
    %12 = vector.extract_strided_slice %6 {offsets = [2, 0], sizes = [1, 384], strides = [1, 1]} : vector<9x384xf32> to vector<1x384xf32>
    %c382_i32 = arith.constant 382 : i32
    %13 = tpu.dynamic_rotate %12 by %c382_i32 dim 1 : vector<1x384xf32>, i32 -> vector<1x384xf32>
    %14 = arith.addf %11, %13 : vector<1x384xf32>
    %15 = vector.extract_strided_slice %6 {offsets = [3, 0], sizes = [1, 384], strides = [1, 1]} : vector<9x384xf32> to vector<1x384xf32>
    %c366_i32 = arith.constant 366 : i32
    %16 = tpu.dynamic_rotate %15 by %c366_i32 dim 1 : vector<1x384xf32>, i32 -> vector<1x384xf32>
    %17 = arith.addf %14, %16 : vector<1x384xf32>
    %18 = vector.extract_strided_slice %6 {offsets = [4, 0], sizes = [1, 384], strides = [1, 1]} : vector<9x384xf32> to vector<1x384xf32>
    %c365_i32 = arith.constant 365 : i32
    %19 = tpu.dynamic_rotate %18 by %c365_i32 dim 1 : vector<1x384xf32>, i32 -> vector<1x384xf32>
    %20 = arith.addf %17, %19 : vector<1x384xf32>
    %21 = vector.extract_strided_slice %6 {offsets = [5, 0], sizes = [1, 384], strides = [1, 1]} : vector<9x384xf32> to vector<1x384xf32>
    %c364_i32 = arith.constant 364 : i32
    %22 = tpu.dynamic_rotate %21 by %c364_i32 dim 1 : vector<1x384xf32>, i32 -> vector<1x384xf32>
    %23 = arith.addf %20, %22 : vector<1x384xf32>
    %24 = vector.extract_strided_slice %6 {offsets = [6, 0], sizes = [1, 384], strides = [1, 1]} : vector<9x384xf32> to vector<1x384xf32>
    %c348_i32 = arith.constant 348 : i32
    %25 = tpu.dynamic_rotate %24 by %c348_i32 dim 1 : vector<1x384xf32>, i32 -> vector<1x384xf32>
    %26 = arith.addf %23, %25 : vector<1x384xf32>
    %27 = vector.extract_strided_slice %6 {offsets = [7, 0], sizes = [1, 384], strides = [1, 1]} : vector<9x384xf32> to vector<1x384xf32>
    %c347_i32 = arith.constant 347 : i32
    %28 = tpu.dynamic_rotate %27 by %c347_i32 dim 1 : vector<1x384xf32>, i32 -> vector<1x384xf32>
    %29 = arith.addf %26, %28 : vector<1x384xf32>
    %30 = vector.extract_strided_slice %6 {offsets = [8, 0], sizes = [1, 384], strides = [1, 1]} : vector<9x384xf32> to vector<1x384xf32>
    %c346_i32 = arith.constant 346 : i32
    %31 = tpu.dynamic_rotate %30 by %c346_i32 dim 1 : vector<1x384xf32>, i32 -> vector<1x384xf32>
    %32 = arith.addf %29, %31 : vector<1x384xf32>
    %cst_7 = arith.constant 5.000000e-01 : f32
    %33 = vector.broadcast %cst_7 : f32 to vector<1x384xf32>
    %34 = arith.mulf %33, %32 : vector<1x384xf32>
    %35 = math.tanh %34 : vector<1x384xf32>
    %cst_8 = arith.constant 5.000000e-01 : f32
    %36 = vector.broadcast %cst_8 : f32 to vector<1x384xf32>
    %37 = arith.mulf %36, %35 : vector<1x384xf32>
    %cst_9 = arith.constant 5.000000e-01 : f32
    %38 = vector.broadcast %cst_9 : f32 to vector<1x384xf32>
    %39 = arith.addf %37, %38 : vector<1x384xf32>
    %c0_10 = arith.constant 0 : index
    %c0_11 = arith.constant 0 : index
    %c0_12 = arith.constant 0 : index
    %40 = vector.load %arg4[%c0_10, %c0_11, %c0_12] : memref<1x1x384xf32, #tpu.memory_space<vmem>>, vector<1x1x384xf32>
    %41 = vector.shape_cast %40 : vector<1x1x384xf32> to vector<1x384xf32>
    %42 = vector.shape_cast %39 : vector<1x384xf32> to vector<1x1x384xf32>
    tpu.vector_store %arg4[%c0_10, %c0_11, %c0_12], %42 {strides = array<i32>} : memref<1x1x384xf32, #tpu.memory_space<vmem>>, vector<1x1x384xf32>,
    return
  }
  func.func @transform_0(%arg0: i32) -> (i32, i32, i32) {
    %c0_i32 = arith.constant 0 : i32
    %c0_i32_0 = arith.constant 0 : i32
    %c0_i32_1 = arith.constant 0 : i32
    return %arg0, %c0_i32, %c0_i32_0 : i32, i32, i32
  }
  func.func @transform_1(%arg0: i32) -> (i32, i32) {
    %c0_i32 = arith.constant 0 : i32
    %c0_i32_0 = arith.constant 0 : i32
    %c0_i32_1 = arith.constant 0 : i32
    return %c0_i32, %c0_i32_0 : i32, i32
  }
  func.func @transform_2(%arg0: i32) -> (i32, i32) {
    %c0_i32 = arith.constant 0 : i32
    %c0_i32_0 = arith.constant 0 : i32
    %c0_i32_1 = arith.constant 0 : i32
    return %c0_i32, %c0_i32_0 : i32, i32
  }
  func.func @transform_3(%arg0: i32) -> (i32, i32, i32) {
    %c0_i32 = arith.constant 0 : i32
    %c0_i32_0 = arith.constant 0 : i32
    %c0_i32_1 = arith.constant 0 : i32
    return %arg0, %c0_i32, %c0_i32_0 : i32, i32, i32
  }
}

</mosaic_0001>

<bundles_post_ra>
// kernel: tpu_custom_call.1
= control target key start
LH: loop header
LB: loop body
LE: loop exit
PB: predicated region body
PF: predicated region fallthrough
CT: control target
= control target key end

     0   :  { %8 = vsyncpa [#allocation3], 0  ;;  %s997_s0 = inlined_call_operand.hbm [shape: f32[2,4,384], index: 0, kind: input, shape index: {}]   ;;  %s998_s1 = inlined_call_operand.vmem [shape: f32[9,4], index: 1, kind: input, shape index: {}]   ;;  %s999_s2 = inlined_call_operand.vmem [shape: f32[1,384], index: 2, kind: input, shape index: {}]   ;;  %s1000_s3 = inlined_call_operand.hbm [shape: f32[2,1,384], index: 3, kind: output, shape index: {}]  }
   0x1   :  { %10 = vsyncpa [#allocation3 + $0x1], 0 }
   0x2   :  { %11 = vsyncpa [#allocation4], 0 }
   0x3   :  { %13 = vsyncpa [#allocation4 + $0x1], 0  ;;  %s791_s12 = smov 0   ;;  %s793_s13 = smov 0  }
   0x4   :  { %s795_s14 = smov 0   ;;  %s797_s15 = smov 0  }
   0x5 LB: > { %s812_s16 = sadd.s32 4294967295, %s761_s15   ;;  %s587_s17 = sadd.s32 4294967294, %s761_s15   ;;  %s761_s15 = sphi %s797_s15, %s1008_s15   ;;  %s757_s14 = sphi %s795_s14, %s1007_s14   ;;  %s753_s13 = sphi %s793_s13, %s1006_s13   ;;  %s749_s12 = sphi %s791_s12, %s1005_s12  }
   0x6   : > { %s816_s18 = sadd.s32 1, %s761_s15   ;;  %s26_s19 = sadd.s32 1, %s757_s14 }
   0x7   : > { %s23_s20 = ssub.s32 %s761_s15, %s816_s18  ;;  %p33_p0 = scmp.ne.s32.totalorder %s757_s14, %s753_s13 }
   0x8   : > { %p24_p1 = scmp.eq.s32.totalorder %s23_s20, 0  ;;  %p34_p2 = scmp.eq.s32.totalorder %s761_s15, 0 }
   0x9   : > { %p39_p3 = scmp.ne.s32.totalorder %s753_s13, %s749_s12  ;;  %p40_p4 = scmp.eq.s32.totalorder %s812_s16, 0 }
   0xa   : > { %s828_s21 = scalar_select %p24_p1, %s757_s14, %s26_s19  }
   0xb   : > { %p35_p5 = por %p34_p2, %p33_p0  ;;  %p830_p6 = por %p40_p4, %p39_p3 }
   0xc   : > { %p105_p7 = scmp.eq.s32.totalorder %s812_s16, 1  ;;  %p111_p8 = scmp.eq.s32.totalorder %s587_s17, 1 }
   0xd   : > { %p589_p9 = scmp.ge.s32.totalorder %s761_s15, 2  ;;  %p621_p10 = scmp.lt.s32.totalorder %s761_s15, 2 }
   0xe   : > { %p837_p11 = por %p105_p7, %p33_p0  ;;  %p841_p12 = por %p111_p8, %p39_p3 }
   0xf   : > { %s137_s25 = sand.u32 1, %s757_s14   ;;  %s605_s26 = smul.u32 12, %s761_s15 }
  0x10   : > { %s604_s27 = smul.u32 12, %s137_s25  ;;  %p850_p13 = pnand %p621_p10, %p35_p5 }
  0x11   : > { %s146_s30 = scalar_lea.hbm %s997_s0, %s605_s26  ;;  %s138_s8 = scalar_lea.sflag [#allocation3], %s137_s25 }
  0x12   : > { %s148_s5 = sshll.u32 %s146_s30, 4  ;;  %s141_s6 = scalar_lea.vmem [#allocation2], %s604_s27  ;;  %s149_s5 = int_to_ptr.hbm [resolvable:$true] %s148_s5 }
  0x13   : > { %s150_s7 = sshll.u32 %s141_s6, 4  ;;  %s665_s9 = sshra.s32 %s149_s5, 4  ;;  %s151_s7 = int_to_ptr.vmem [resolvable:$true] %s150_s7  ;;  %s666_s9 = int_to_ptr.hbm [resolvable:$true] %s665_s9 }
  0x14   : > { %s667_s10 = scalar_lea.hbm %s666_s9, 12  ;;  %p669_p1 = pneg %p850_p13 }
  0x15   : > { %p668_p0 = scmp.ne.s32.totalorder %s666_s9, %s667_s10  ;;  %s672_s19 = scalar_lea.hbm %s997_s0, 24 }
  0x16   : > { %p673_p4 = scmp.lt.s32.totalorder %s666_s9, %s997_s0  ;;  %p674_p5 = scmp.lt.s32.totalorder %s672_s19, %s667_s10 }
  0x17   : > { %p670_p2 = pnand %p669_p1, %p668_p0 }
  0x18   : > { %p675_p7 = por %p674_p5, %p673_p4 }
  0x19   : > { %p671_p3 = pneg %p670_p2 }
  0x1b   : > { %p676_p8 = pnand %p675_p7, %p671_p3 }
  0x1d   : > { %679 = shalt.err (!%p676_p8)
}
  0x1e   : > { %616 = dma.hbm_to_vmem [thread:$0]  (!%p850_p13), %s149_s5, 192, %s151_s7, %s138_s8  }
  0x1f   : > { %p591_p10 = scmp.ge.s32.totalorder %s761_s15, 1  ;;  %p155_p0 = scmp.lt.s32.totalorder %s761_s15, 3 }
  0x21   : > { %p156_p1 = pnand %p591_p10, %p155_p0 }
  0x22   : > { %s867_s25 = sand.u32 (!%p156_p1), 1, %s753_s13  }
  0x23   : > { %159 = sbr.rel (%p156_p1) target bundleno = 376 (0x178), region = 32  ;;  %s162_s28 = scalar_lea.sflag (!%p156_p1), [#allocation3], %s867_s25 }
  0x24   : > { %s606_s27 = smul.u32 (!%p156_p1), 12, %s867_s25 }
  0x26   : > { %s165_s29 = scalar_lea.vmem (!%p156_p1), [#allocation2], %s606_s27 }
  0x28   : > { %740 = dma.done.wait (%p830_p6), %s162_s28, 192  }
  0x29   : > { %742 = vsyncadd (%p830_p6), %s162_s28, 4294967104  ;;  %v192_v0 = vld [vmem:[%s165_s29] sm:$0xff]  ;;  %v193_v1 = vld [vmem:[%s165_s29 + $0x8] sm:$0xf]  ;;  %vm211_vm0 = vcmask 1043456   ;;  %vm204_vm1 = vcmask 31744   ;;  %v310_v51 = vlaneseq }
  0x2a   : > { %v194_v2 = vmax.f32 %v192_v0, 0.0  ;;  %v195_v3 = vmax.f32 %v193_v1, 0.0  ;;  %v189_v4 = vld [vmem:[%s998_s1] sm:$0xff]  ;;  %v190_v8 = vld [vmem:[%s998_s1 + $0x8] sm:$0x1]  ;;  %s763_s6 = smov 126  }
  0x2b   : > { %s764_s7 = smov 127   ;;  %vm292_vm2 = vcmask 1040384   ;;  %vm294_vm3 = vcmask 1041408   ;;  %s765_s8 = smov 110   ;;  %v894_v54 = vand.u32 127, %v310_v51  ;;  %vm498_vm12 = vcmp.lt.s32.totalorder %v310_v51, 384 }
  0x2c   : > { %198 = vst [vmem:[#allocation1] ss:$2 sm:$0xff] %v194_v2  ;;  %s766_s9 = smov 109   ;;  %s767_s10 = smov 108   ;;  %v191_v56 = vld [vmem:[%s999_s2] sm:$0x7] }
  0x2d   : > { %200 = vst [vmem:[#allocation1 + $0x10] ss:$2 sm:$0xff] %v195_v3  ;;  %s768_s11 = smov 92   ;;  %s769_s17 = smov 91   ;;  %vm337_vm4 = vcmp.lt.s32.totalorder %v894_v54, 126  ;;  %vm312_vm5 = vcmp.lt.s32.totalorder %v894_v54, 127 }
  0x2e   : > { %s770_s19 = smov 90   ;;  %vm362_vm6 = vcmp.lt.s32.totalorder %v894_v54, 110  ;;  %vm387_vm7 = vcmp.lt.s32.totalorder %v894_v54, 109  ;;  %vm412_vm8 = vcmp.lt.s32.totalorder %v894_v54, 108  ;;  %vm436_vm9 = vcmp.lt.s32.totalorder %v894_v54, 92  ;;  %s607_s27 = smul.u32 3, %s867_s25 }
  0x2f   : > { %vm460_vm10 = vcmp.lt.s32.totalorder %v894_v54, 91  ;;  %vm479_vm11 = vcmp.lt.s32.totalorder %v894_v54, 90  ;;  %s608_s28 = smul.u32 3, %s812_s16 }
  0x30   : > { %s188_s22 = scalar_lea.vmem [#allocation5], %s607_s27 }
  0x31   : > { %s512_s4 = scalar_lea.hbm %s1000_s3, %s608_s28  ;;  %s514_s5 = sshll.u32 %s188_s22, 4  ;;  %s515_s5 = int_to_ptr.vmem [resolvable:$true] %s514_s5 }
  0x33   : > { %v201_v5 = vld.sshfl [vmem:[#allocation1] sm:$0xff pattern:$0x75316420]  ;;  %v202_v6 = vld.sshfl [vmem:[#allocation1 + $0x8] sm:$0xff pattern:$0x75316420] }
  0x34   : > { %592 = vmatpush.msk.msra.mxu0 %vm211_vm0, %v201_v5  ;;  %595 = vmatpush.msk.msra.mxu1 %vm211_vm0, %v202_v6  ;;  %v203_v7 = vld.sshfl [vmem:[#allocation1 + $0x10] sm:$0xff pattern:$0x75316420] }
  0x35   : > { %598 = vmatpush.msk.msra.mxu2 %vm211_vm0, %v203_v7  ;;  %593 = vmatmul.msk.f32.vlgmr.msra.gmra.mxu0 %vm204_vm1, %v189_v4 }
  0x36   : > { %596 = vmatmul.msk.f32.vlgmr.msra.gmra.mxu1 %vm204_vm1, %v189_v4  ;;  %599 = vmatmul.msk.f32.vlgmr.msra.gmra.mxu2 %vm204_vm1, %v189_v4 }
  0x37   : > { %603 = vmatpush.msk.msra.mxu3 %vm211_vm0, %v201_v5 }
  0x38   : > { %594 = vmatmul.msk.f32.vlgmr.msra.gmra.mxu3 %vm204_vm1, %v190_v8 }
  0x3e   : > { %600 = vmatmul.msk.f32.gmra.mxu2 %vm204_vm1, %v190_v8  ;;  %597 = vmatmul.msk.f32.gmra.mxu1 %vm204_vm1, %v190_v8 }
  0xb2   : > { %v235_v9 = vpop.f32.mrf.mxu0 }
  0xb3   : > { %v258_v10 = vpop.f32.mrf.mxu1  ;;  %v325_v11 = vrot.slane %v235_v9, 2  ;;  %v298_v12 = vrot.slane %v235_v9, 1  ;;  %v350_v17 = vrot.slane %v235_v9, 3  ;;  %v375_v23 = vrot.slane %v235_v9, 4 }
  0xb4   : > { %v299_v13 = vrot.slane %v258_v10, 1  ;;  %v290_v14 = vrot.slane %v258_v10, 7  ;;  %v326_v18 = vrot.slane %v258_v10, 2  ;;  %v351_v20 = vrot.slane %v258_v10, 3 }
  0xb5   : > { %331 = vrot.lane.b32.xlu2 %v325_v11, %s763_s6  ;;  %304 = vrot.lane.b32.xlu1 %v298_v12, %s764_s7  ;;  %v376_v24 = vrot.slane %v258_v10, 4  ;;  %v400_v25 = vrot.slane %v235_v9, 5  ;;  %v401_v27 = vrot.slane %v258_v10, 5  ;;  %v425_v28 = vrot.slane %v235_v9, 6 }
  0xb6   : > { %306 = vrot.lane.b32.xlu0 %v299_v13, %s764_s7  ;;  %v293_v15 = vsel %vm292_vm2, %v235_v9, %v290_v14  ;;  %v426_v30 = vrot.slane %v258_v10, 6  ;;  %v449_v33 = vrot.slane %v235_v9, 7 }
  0xb9   : > { %v281_v16 = vpop.f32.mrf.mxu2 }
  0xba   : > { %v291_v19 = vrot.slane %v281_v16, 6  ;;  %v352_v22 = vrot.slane %v281_v16, 3  ;;  %v377_v26 = vrot.slane %v281_v16, 4  ;;  %v402_v29 = vrot.slane %v281_v16, 5 }
  0xbb   : > { %v327_v31 = vrot.slane %v281_v16, 2  ;;  %v300_v32 = vrot.slane %v281_v16, 1  ;;  %v450_v34 = vrot.slane %v281_v16, 7  ;;  %v238_v36 = vpop.f32.mrf.mxu3  ;;  %v261_v37 = vpop.f32.mrf.mxu1 }
  0xbc   : > { %v887_v21 = vsel %vm294_vm3, %v293_v15, %v291_v19 }
  0xbd   : > { %356 = vrot.lane.b32.xlu2 %v350_v17, %s765_s8  ;;  %333 = vrot.lane.b32.xlu1 %v326_v18, %s763_s6  ;;  %v297_v59 = vadd.f32 %v887_v21, %v191_v56 }
  0xbe   : > { %358 = vrot.lane.b32.xlu0 %v351_v20, %s765_s8 }
  0xc1   : > { %v284_v35 = vpop.f32.mrf.mxu2 }
  0xc5   : > { %381 = vrot.lane.b32.xlu2 %v375_v23, %s766_s9  ;;  %360 = vrot.lane.b32.xlu1 %v352_v22, %s765_s8 }
  0xc6   : > { %383 = vrot.lane.b32.xlu0 %v376_v24, %s766_s9 }
  0xcd   : > { %406 = vrot.lane.b32.xlu2 %v400_v25, %s767_s10  ;;  %385 = vrot.lane.b32.xlu1 %v377_v26, %s766_s9 }
  0xce   : > { %408 = vrot.lane.b32.xlu0 %v401_v27, %s767_s10 }
  0xd5   : > { %430 = vrot.lane.b32.xlu2 %v425_v28, %s768_s11  ;;  %410 = vrot.lane.b32.xlu1 %v402_v29, %s767_s10 }
  0xd6   : > { %432 = vrot.lane.b32.xlu0 %v426_v30, %s768_s11 }
  0xdd   : > { %335 = vrot.lane.b32.xlu2 %v327_v31, %s763_s6  ;;  %434 = vrot.lane.b32.xlu1 %v291_v19, %s768_s11  ;;  %s516_s6 = sshll.u32 %s512_s4, 4  ;;  %s715_s11 = scalar_lea.hbm %s1000_s3, 6  ;;  %s517_s6 = int_to_ptr.hbm [resolvable:$true] %s516_s6 }
  0xde   : > { %308 = vrot.lane.b32.xlu0 %v300_v32, %s764_s7  ;;  %s502_s7 = scalar_lea.sflag [#allocation4], %s867_s25  ;;  %s709_s8 = sshra.s32 %s517_s6, 4  ;;  %s710_s8 = int_to_ptr.hbm [resolvable:$true] %s709_s8 }
  0xdf   : > { %s711_s16 = scalar_lea.hbm %s710_s8, 3  ;;  %p716_p3 = scmp.lt.s32.totalorder %s710_s8, %s1000_s3 }
  0xe0   : > { %p712_p6 = scmp.ne.s32.totalorder %s710_s8, %s711_s16  ;;  %p717_p4 = scmp.lt.s32.totalorder %s715_s11, %s711_s16 }
  0xe2   : > { %p713_p13 = pnand %p712_p6, %p837_p11  ;;  %p718_p5 = por %p717_p4, %p716_p3 }
  0xe4   : > { %p714_p2 = pneg %p713_p13 }
  0xe5   : > { %454 = vrot.lane.b32.xlu2 %v449_v33, %s769_s17  ;;  %458 = vrot.lane.b32.xlu1 %v450_v34, %s769_s17 }
  0xe6   : > { %456 = vrot.lane.b32.xlu0 %v290_v14, %s769_s17  ;;  %p719_p7 = pnand %p718_p5, %p714_p2 }
  0xed   : > { %477 = vrot.lane.b32.xlu1 %v284_v35, %s770_s19  ;;  %473 = vrot.lane.b32.xlu2 %v238_v36, %s770_s19 }
  0xee   : > { %475 = vrot.lane.b32.xlu0 %v261_v37, %s770_s19 }
 0x10f   : > { %v332_v38 = vpop.permute.xlu2 %331 }
 0x117   : > { %v357_v39 = vpop.permute.xlu2 %356 }
 0x11f   : > { %v382_v42 = vpop.permute.xlu2 %381 }
 0x127   : > { %v305_v40 = vpop.permute.xlu1 %304  ;;  %v407_v45 = vpop.permute.xlu2 %406 }
 0x128   : > { %v307_v41 = vpop.permute.xlu0 %306 }
 0x129   : > { %v314_v0 = vsel %vm312_vm5, %v305_v40, %v307_v41 }
 0x12f   : > { %v334_v43 = vpop.permute.xlu1 %333  ;;  %v891_v49 = vpop.permute.xlu2 %430 }
 0x130   : > { %v359_v44 = vpop.permute.xlu0 %358  ;;  %v339_v9 = vsel %vm337_vm4, %v332_v38, %v334_v43 }
 0x131   : > { %v364_v8 = vsel %vm362_vm6, %v357_v39, %v359_v44 }
 0x137   : > { %v361_v46 = vpop.permute.xlu1 %360  ;;  %v336_v55 = vpop.permute.xlu2 %335 }
 0x138   : > { %v384_v47 = vpop.permute.xlu0 %383  ;;  %v338_v57 = vsel %vm337_vm4, %v334_v43, %v336_v55  ;;  %v363_v58 = vsel %vm362_vm6, %v359_v44, %v361_v46  ;;  %v340_v61 = vsel %vm337_vm4, %v336_v55, %v332_v38  ;;  %v365_v4 = vsel %vm362_vm6, %v361_v46, %v357_v39 }
 0x139   : > { %v344_v62 = vrot.slane %v338_v57, 7  ;;  %v369_v5 = vrot.slane %v363_v58, 7  ;;  %v345_v10 = vrot.slane %v340_v61, 6  ;;  %v370_v16 = vrot.slane %v365_v4, 6 }
 0x13a   : > { %v389_v24 = vsel %vm387_vm7, %v382_v42, %v384_v47 }
 0x13b   : > { %v346_v12 = vsel %vm292_vm2, %v339_v9, %v344_v62  ;;  %v371_v20 = vsel %vm292_vm2, %v364_v8, %v369_v5 }
 0x13c   : > { %v347_v25 = vsel %vm294_vm3, %v346_v12, %v345_v10  ;;  %v372_v33 = vsel %vm294_vm3, %v371_v20, %v370_v16 }
 0x13f   : > { %v386_v48 = vpop.permute.xlu1 %385  ;;  %v455_v17 = vpop.permute.xlu2 %454 }
 0x140   : > { %v409_v50 = vpop.permute.xlu0 %408  ;;  %v388_v1 = vsel %vm387_vm7, %v384_v47, %v386_v48  ;;  %v390_v13 = vsel %vm387_vm7, %v386_v48, %v382_v42 }
 0x141   : > { %v394_v14 = vrot.slane %v388_v1, 7  ;;  %v395_v26 = vrot.slane %v390_v13, 6  ;;  %v414_v34 = vsel %vm412_vm8, %v407_v45, %v409_v50 }
 0x143   : > { %v396_v28 = vsel %vm292_vm2, %v389_v24, %v394_v14 }
 0x144   : > { %v397_v39 = vsel %vm294_vm3, %v396_v28, %v395_v26 }
 0x147   : > { %v411_v52 = vpop.permute.xlu1 %410  ;;  %v474_v47 = vpop.permute.xlu2 %473 }
 0x148   : > { %v433_v53 = vpop.permute.xlu0 %432  ;;  %v413_v11 = vsel %vm412_vm8, %v409_v50, %v411_v52  ;;  %v415_v21 = vsel %vm412_vm8, %v411_v52, %v407_v45 }
 0x149   : > { %v419_v22 = vrot.slane %v413_v11, 7  ;;  %v420_v35 = vrot.slane %v415_v21, 6 }
 0x14b   : > { %v421_v37 = vsel %vm292_vm2, %v414_v34, %v419_v22 }
 0x14c   : > { %v422_v46 = vsel %vm294_vm3, %v421_v37, %v420_v35 }
 0x14f   : > { %v435_v60 = vpop.permute.xlu1 %434 }
 0x150   : > { %v309_v63 = vpop.permute.xlu0 %308  ;;  %v437_v19 = vsel %vm436_vm9, %v433_v53, %v435_v60  ;;  %v439_v30 = vsel %vm436_vm9, %v435_v60, %v891_v49 }
 0x151   : > { %v313_v2 = vsel %vm312_vm5, %v307_v41, %v309_v63  ;;  %v315_v3 = vsel %vm312_vm5, %v309_v63, %v305_v40  ;;  %v443_v31 = vrot.slane %v437_v19, 7  ;;  %v438_v40 = vsel %vm436_vm9, %v891_v49, %v433_v53 }
 0x152   : > { %v319_v6 = vrot.slane %v313_v2, 7  ;;  %v320_v7 = vrot.slane %v315_v3, 6  ;;  %v444_v41 = vrot.slane %v439_v30, 6 }
 0x153   : > { %v445_v43 = vsel %vm292_vm2, %v438_v40, %v443_v31 }
 0x154   : > { %v321_v15 = vsel %vm292_vm2, %v314_v0, %v319_v6  ;;  %v446_v50 = vsel %vm294_vm3, %v445_v43, %v444_v41 }
 0x155   : > { %v322_v18 = vsel %vm294_vm3, %v321_v15, %v320_v7 }
 0x156   : > { %v324_v23 = vadd.f32 %v322_v18, %v297_v59 }
 0x157   : > { %v459_v27 = vpop.permute.xlu1 %458 }
 0x158   : > { %v349_v29 = vadd.f32 %v347_v25, %v324_v23  ;;  %v457_v32 = vpop.permute.xlu0 %456  ;;  %v463_v44 = vsel %vm460_vm10, %v459_v27, %v455_v17 }
 0x159   : > { %v461_v36 = vsel %vm460_vm10, %v457_v32, %v459_v27  ;;  %v462_v52 = vsel %vm460_vm10, %v455_v17, %v457_v32  ;;  %v468_v49 = vrot.slane %v463_v44, 6 }
 0x15a   : > { %v374_v38 = vadd.f32 %v372_v33, %v349_v29  ;;  %v467_v45 = vrot.slane %v461_v36, 7 }
 0x15c   : > { %v399_v42 = vadd.f32 %v397_v39, %v374_v38  ;;  %v469_v56 = vsel %vm292_vm2, %v462_v52, %v467_v45 }
 0x15d   : > { %v470_v62 = vsel %vm294_vm3, %v469_v56, %v468_v49 }
 0x15e   : > { %v424_v48 = vadd.f32 %v422_v46, %v399_v42 }
 0x15f   : > { %v478_v53 = vpop.permute.xlu1 %477 }
 0x160   : > { %v448_v55 = vadd.f32 %v446_v50, %v424_v48  ;;  %v476_v57 = vpop.permute.xlu0 %475  ;;  %v482_v58 = vsel %vm479_vm11, %v478_v53, %v474_v47 }
 0x161   : > { %v480_v59 = vsel %vm479_vm11, %v476_v57, %v478_v53  ;;  %v487_v60 = vrot.slane %v482_v58, 6  ;;  %v481_v63 = vsel %vm479_vm11, %v474_v47, %v476_v57 }
 0x162   : > { %v486_v61 = vrot.slane %v480_v59, 7  ;;  %v472_v0 = vadd.f32 %v470_v62, %v448_v55 }
 0x164   : > { %v488_v1 = vsel %vm292_vm2, %v481_v63, %v486_v61 }
 0x165   : > { %v489_v54 = vsel %vm294_vm3, %v488_v1, %v487_v60 }
 0x166   : > { %v491_v2 = vadd.f32 %v489_v54, %v472_v0 }
 0x168   : > { %v492_v3 = vmul.f32 0.5, %v491_v2 }
 0x16a   : > { %663 = vtanh.f32 %v492_v3 }
 0x170   : > { %v664_v4 = vpop.eup %663 }
 0x171   : > { %v494_v5 = vmul.f32 0.5, %v664_v4 }
 0x173   : > { %v495_v6 = vadd.f32 0.5, %v494_v5 }
 0x175   : > { %500 = vst.msk [vmem:[%s188_s22] sm:$0x7] %vm498_vm12, %v495_v6 }
 0x176   : > { %722 = shalt.err (!%p719_p7)
}
 0x177   : > { %611 = dma.vmem_to_hbm [thread:$0]  (%p837_p11), %s515_s5, 48, %s517_s6, %s502_s7  }
 0x178 PF: > { %s528_s25 = sand.u32 1, %s749_s12   ;;  %p618_p8 = pnand %p589_p9, %p841_p12 }
 0x179   : > { %s529_s20 = scalar_lea.sflag [#allocation4], %s528_s25 }
 0x17a   : > { %p619_p10 = pneg %p618_p8 }
 0x17c   : > { %744 = dma.done.wait (%p619_p10), %s529_s20, 48  }
 0x17d   : > { %746 = vsyncadd (%p619_p10), %s529_s20, 4294967248  ;;  %p16_p0 = scmp.ge.s32.totalorder %s816_s18, 4   ;;  %s1005_s12 = smov %s753_s13 }
 0x17e   : > { %s1006_s13 = smov %s757_s14  ;;  %s1007_s14 = smov %s828_s21 }
 0x17f   : > { %s1008_s15 = smov %s816_s18  ;;  %18 = sbr.rel (!%p16_p0) target bundleno = 5 (0x5), region = 78 }
 0x184   :  { %535 = vsyncpa [#allocation3], 1 }
 0x185   :  { %537 = vsyncpa [#allocation3 + $0x1], 1 }
 0x186   :  { %538 = vsyncpa [#allocation4], 1 }
 0x187   :  { %540 = vsyncpa [#allocation4 + $0x1], 1 }

</bundles_post_ra>
